<compile_context>
chip_gen: v7x
topology: tpu7x:2x2x1
jax: 0.10.0
libtpu: 0.0.40
codegen_flags: <defaults>
</compile_context>

<pallas_src>
import jax
import jax.numpy as jnp
from jax.experimental import pallas as pl
from jax.experimental.pallas import tpu as pltpu

EPS = 1e-5          # nn.BatchNorm1d default eps
NR_PAD = 16         # 10-class head padded to one f32 sublane group


# --------------------------------------------------------------------------------------
# Fused kernel: BatchNorm1d (training-mode batch stats) + ReLU + compact LDR head matmul
# Single block — the whole problem lives in VMEM, one kernel invocation, one output write.
# --------------------------------------------------------------------------------------
def _make_bn_relu_ldr_head_kernel(true_b, batch_padded):
    def kernel(x_ref, gamma_ref, beta_ref, w_ref, bias_ref, out_ref):
        x = x_ref[...]                                              # (Bp, N) f32

        # BatchNorm1d training-mode statistics over the *true* batch (biased variance).
        # Padded batch rows (if any) are zero from jnp.pad, so the sum/mean is already
        # correct; only the centered values need masking for the variance.
        inv_b = jnp.float32(1.0 / true_b)
        mean = jnp.sum(x, axis=0, keepdims=True) * inv_b            # (1, N)
        cent = x - mean
        if batch_padded:
            row = jax.lax.broadcasted_iota(jnp.int32, cent.shape, 0)
            cent = jnp.where(row < true_b, cent, 0.0)
        var = jnp.sum(cent * cent, axis=0, keepdims=True) * inv_b   # (1, N)

        # Affine reordered: one (1, N) row multiply, then a single full-tile FMA.
        scale = gamma_ref[...] * jax.lax.rsqrt(var + EPS)           # (1, N)
        h = jnp.maximum(cent * scale + beta_ref[...], 0.0)          # ReLU, (Bp, N)

        # (Bp, N) x (NRp, N)^T -> (Bp, NRp): bf16 MXU inputs, f32 accumulation,
        # class bias folded into the single output write.
        out_ref[...] = bias_ref[...] + jax.lax.dot_general(
            h.astype(jnp.bfloat16), w_ref[...],
            (((1,), (1,)), ((), ())),
            preferred_element_type=jnp.float32)

    return kernel


def ldr_head(x_flat, gamma2d, beta2d, w_head_c, bias_head):
    """out = ReLU(BN_train(x_flat)) @ w_head_c.T + bias_head, shape (B, NR_PAD)."""
    B, N = x_flat.shape
    NRp, Nw = w_head_c.shape
    assert Nw == N and gamma2d.shape == (1, N) and beta2d.shape == (1, N)
    assert bias_head.shape == (1, NRp)

    # Pad batch to the f32 sublane tile only if needed (not at demo size B=8).
    b_pad = ((B + 7) // 8) * 8
    if b_pad != B:
        x_flat = jnp.pad(x_flat, ((0, b_pad - B), (0, 0)))

    vmem = pl.BlockSpec(memory_space=pltpu.MemorySpace.VMEM)
    out = pl.pallas_call(
        _make_bn_relu_ldr_head_kernel(B, b_pad != B),
        out_shape=jax.ShapeDtypeStruct((b_pad, NRp), jnp.float32),
        in_specs=[vmem, vmem, vmem, vmem, vmem],
        out_specs=vmem,
    )(x_flat, gamma2d, beta2d, w_head_c, bias_head)
    return out[:B]


# --------------------------------------------------------------------------------------
# LDR-subdiagonal weight reconstruction (one-time parameter setup, plain JAX).
# Head rows only; never materializes the (N, N) Krylov matrices.
# --------------------------------------------------------------------------------------
def ldr_subdiagonal_head_weight(G, H, subdiag_a, subdiag_b, num_rows):
    """First `num_rows` rows of W = sum_r K(Z_A, g_r) @ K(Z_B, h_r)^T (corner=False).

    W[a, b] = sum_r sum_j (Z_A^j g_r)[a] * (Z_B^j h_r)[b]. Since (Z^j v)[a] = 0 for
    j > a with the subdiagonal shift, only j < num_rows contribute to the head rows,
    so the scan runs num_rows steps and accumulates rank-1 outer products.
    """
    r, n = G.shape

    def step(carry, _):
        ug, uh, acc = carry
        acc = acc + jnp.outer(ug[:num_rows], uh)
        ug = jnp.concatenate([jnp.zeros((1,), ug.dtype), subdiag_a * ug[:-1]])
        uh = jnp.concatenate([jnp.zeros((1,), uh.dtype), subdiag_b * uh[:-1]])
        return (ug, uh, acc), None

    W = jnp.zeros((num_rows, n), jnp.float32)
    for i in range(r):
        (_, _, W), _ = jax.lax.scan(step, (G[i], H[i], W), None, length=num_rows)
    return W


# --------------------------------------------------------------------------------------
if __name__ == "__main__":
    B = 8
    C, NC, HH, WW = 3, 16, 8, 8       # small analog of the (3, 81, 8, 8) scattering output
    N = C * NC * HH * WW              # 3072
    rank = 4
    num_classes = 10

    key = jax.random.PRNGKey(0)
    kx, kg, kh = jax.random.split(key, 3)

    # Post-scattering activations (stand-in for Scattering2D output).
    x_scat = jax.random.normal(kx, (B, C, NC, HH, WW), dtype=jnp.float32)

    # BatchNorm1d(N) affine parameters (PyTorch default init).
    gamma = jnp.ones((N,), jnp.float32)
    beta = jnp.zeros((N,), jnp.float32)

    # LDRSubdiagonal(layer_size=N, corner=False, r=rank) parameters, deterministic init.
    G = 0.01 * jax.random.normal(kg, (rank, N), dtype=jnp.float32)
    Hm = 0.01 * jax.random.normal(kh, (rank, N), dtype=jnp.float32)
    subdiag_a = jnp.ones((N - 1,), jnp.float32)
    subdiag_b = jnp.ones((N - 1,), jnp.float32)
    bias = jnp.zeros((N,), jnp.float32)

    # One-time parameter setup (off the hot path): only the consumed head rows are
    # reconstructed, padded 10 -> 16 rows, stored compact (NR_PAD, N) in bf16.
    W_head = ldr_subdiagonal_head_weight(G, Hm, subdiag_a, subdiag_b, num_classes)  # (10, N)
    w_head_c = jnp.pad(W_head, ((0, NR_PAD - num_classes), (0, 0))).astype(jnp.bfloat16)
    bias_head = jnp.pad(bias[:num_classes], (0, NR_PAD - num_classes)).reshape(1, NR_PAD)
    gamma2d = gamma.reshape(1, N)
    beta2d = beta.reshape(1, N)

    # Forward pass (mirrors: reshape -> batch_norm -> relu -> ldr -> [..., :10]).
    x_flat = x_scat.reshape(B, -1)
    y_pad = ldr_head(x_flat, gamma2d, beta2d, w_head_c, bias_head)
    y = y_pad[:, :num_classes]
    y = jax.block_until_ready(y)
    assert y.shape == (B, num_classes)

    # Pure-JAX reference for correctness (f32 weights, training-mode BN).
    mean = jnp.mean(x_flat, axis=0, keepdims=True)
    var = jnp.mean((x_flat - mean) ** 2, axis=0, keepdims=True)
    h_ref = jnp.maximum(gamma * (x_flat - mean) * jax.lax.rsqrt(var + EPS) + beta, 0.0)
    y_ref = h_ref @ W_head.T + bias[:num_classes]
    assert jnp.allclose(y, y_ref, rtol=1e-3, atol=1e-3), float(jnp.max(jnp.abs(y - y_ref)))

    print("KERNEL_OK")
</pallas_src>

<mosaic_0001>
module attributes {stable_mosaic.version = 11 : i64} {
  func.func @kernel(%arg0: memref<8x3072xf32, #tpu.memory_space<vmem>>, %arg1: memref<1x3072xf32, #tpu.memory_space<vmem>>, %arg2: memref<1x3072xf32, #tpu.memory_space<vmem>>, %arg3: memref<16x3072xbf16, #tpu.memory_space<vmem>>, %arg4: memref<1x16xf32, #tpu.memory_space<vmem>>, %arg5: memref<8x16xf32, #tpu.memory_space<vmem>>) attributes {dimension_semantics = [], scalar_prefetch = 0 : i64, scratch_operands = 0 : i64, tpu.core_type = #tpu.core_type<tc>} {
    %c0 = arith.constant 0 : index
    %c0_0 = arith.constant 0 : index
    %0 = vector.load %arg0[%c0, %c0_0] : memref<8x3072xf32, #tpu.memory_space<vmem>>, vector<8x3072xf32>
    %cst = arith.constant dense<0.000000e+00> : vector<3072xf32>
    %1 = vector.multi_reduction <add>, %0, %cst [0] : vector<8x3072xf32> to vector<3072xf32>
    %2 = vector.shape_cast %1 : vector<3072xf32> to vector<1x3072xf32>
    %cst_1 = arith.constant 1.250000e-01 : f32
    %3 = vector.broadcast %cst_1 : f32 to vector<1x3072xf32>
    %4 = arith.mulf %2, %3 : vector<1x3072xf32>
    %5 = vector.broadcast %4 : vector<1x3072xf32> to vector<8x3072xf32>
    %6 = arith.subf %0, %5 : vector<8x3072xf32>
    %7 = arith.mulf %6, %6 : vector<8x3072xf32>
    %cst_2 = arith.constant dense<0.000000e+00> : vector<3072xf32>
    %8 = vector.multi_reduction <add>, %7, %cst_2 [0] : vector<8x3072xf32> to vector<3072xf32>
    %9 = vector.shape_cast %8 : vector<3072xf32> to vector<1x3072xf32>
    %cst_3 = arith.constant 1.250000e-01 : f32
    %10 = vector.broadcast %cst_3 : f32 to vector<1x3072xf32>
    %11 = arith.mulf %9, %10 : vector<1x3072xf32>
    %c0_4 = arith.constant 0 : index
    %c0_5 = arith.constant 0 : index
    %12 = vector.load %arg1[%c0_4, %c0_5] : memref<1x3072xf32, #tpu.memory_space<vmem>>, vector<1x3072xf32>
    %cst_6 = arith.constant 9.99999974E-6 : f32
    %13 = vector.broadcast %cst_6 : f32 to vector<1x3072xf32>
    %14 = arith.addf %11, %13 : vector<1x3072xf32>
    %15 = math.rsqrt %14 : vector<1x3072xf32>
    %16 = arith.mulf %12, %15 : vector<1x3072xf32>
    %17 = vector.broadcast %16 : vector<1x3072xf32> to vector<8x3072xf32>
    %18 = arith.mulf %6, %17 : vector<8x3072xf32>
    %c0_7 = arith.constant 0 : index
    %c0_8 = arith.constant 0 : index
    %19 = vector.load %arg2[%c0_7, %c0_8] : memref<1x3072xf32, #tpu.memory_space<vmem>>, vector<1x3072xf32>
    %20 = vector.broadcast %19 : vector<1x3072xf32> to vector<8x3072xf32>
    %21 = arith.addf %18, %20 : vector<8x3072xf32>
    %cst_9 = arith.constant 0.000000e+00 : f32
    %22 = vector.broadcast %cst_9 : f32 to vector<8x3072xf32>
    %23 = arith.maximumf %21, %22 : vector<8x3072xf32>
    %c0_10 = arith.constant 0 : index
    %c0_11 = arith.constant 0 : index
    %24 = vector.load %arg4[%c0_10, %c0_11] : memref<1x16xf32, #tpu.memory_space<vmem>>, vector<1x16xf32>
    %25 = arith.truncf %23 : vector<8x3072xf32> to vector<8x3072xbf16>
    %c0_12 = arith.constant 0 : index
    %c0_13 = arith.constant 0 : index
    %26 = vector.load %arg3[%c0_12, %c0_13] : memref<16x3072xbf16, #tpu.memory_space<vmem>>, vector<16x3072xbf16>
    %cst_14 = arith.constant dense<0.000000e+00> : vector<8x16xf32>
    %27 = tpu.matmul %25, %26, %cst_14 {dimension_numbers = #tpu.dot_dimension_numbers<[1], [1], [0], [0], [0, 0, 1, 0], [], []>} : vector<8x3072xbf16>, vector<16x3072xbf16>, vector<8x16xf32> -> vector<8x16xf32>
    %28 = vector.broadcast %24 : vector<1x16xf32> to vector<8x16xf32>
    %29 = arith.addf %28, %27 : vector<8x16xf32>
    %c0_15 = arith.constant 0 : index
    %c0_16 = arith.constant 0 : index
    %30 = vector.load %arg5[%c0_15, %c0_16] : memref<8x16xf32, #tpu.memory_space<vmem>>, vector<8x16xf32>
    tpu.vector_store %arg5[%c0_15, %c0_16], %29 {strides = array<i32>} : memref<8x16xf32, #tpu.memory_space<vmem>>, vector<8x16xf32>,
    return
  }
}

</mosaic_0001>

<bundles_post_ra>
// kernel: tpu_custom_call.1
= control target key start
LH: loop header
LB: loop body
LE: loop exit
PB: predicated region body
PF: predicated region fallthrough
CT: control target
= control target key end

     0   :  { %10 = vsyncpa [#allocation3], 0  ;;  %s2542_s0 = inlined_call_operand.hbm [shape: f32[8,3072], index: 0, kind: input, shape index: {}]   ;;  %s2543_s1 = inlined_call_operand.hbm [shape: f32[1,3072], index: 1, kind: input, shape index: {}]   ;;  %s2544_s2 = inlined_call_operand.hbm [shape: f32[1,3072], index: 2, kind: input, shape index: {}]   ;;  %s2545_s3 = inlined_call_operand.hbm [shape: bf16[16,3072], index: 3, kind: input, shape index: {}]   ;;  %s2546_s4 = inlined_call_operand.vmem [shape: f32[1,16], index: 4, kind: input, shape index: {}]   ;;  %s2547_s5 = inlined_call_operand.hbm [shape: f32[8,16], index: 5, kind: output, shape index: {}]  }
   0x1   :  { %11 = vsyncpa [#allocation6], 0 }
   0x2   :  { %12 = vsyncpa [#allocation9], 0 }
   0x3   :  { %13 = vsyncpa [#allocation4], 0  ;;  %s1902_s18 = smov [#allocation5]   ;;  %s1903_s20 = smov [#allocation2]  }
   0x4   :  { %s30_s19 = sshll.u32 %s1902_s18, 4  ;;  %s20_s21 = sshll.u32 %s1903_s20, 4  ;;  %s31_s19 = int_to_ptr.vmem [resolvable:$true] %s30_s19  ;;  %s21_s21 = int_to_ptr.vmem [resolvable:$true] %s20_s21 }
   0x5   :  { %s1784_s24 = scalar_lea.hbm %s2543_s1, 384 }
   0x6   :  { %p1785_p0 = scmp.ne.s32.totalorder %s2543_s1, %s1784_s24  ;;  %p1788_p1 = scmp.lt.u32.totalorder %s1784_s24, %s2543_s1 }
   0x8   :  { %p1790_p2 = pnand %p1788_p1, %p1785_p0 }
   0xa   :  { %1793 = shalt.err (!%p1790_p2)
}
   0xb   :  { %s1794_s29 = scalar_lea.vmem %s31_s19, 384  ;;  %p1799_p4 = scmp.lt.s32.totalorder %s31_s19, %s31_s19 }
   0xc   :  { %p1795_p3 = scmp.ne.s32.totalorder %s31_s19, %s1794_s29  ;;  %p1800_p5 = scmp.lt.s32.totalorder %s1794_s29, %s1794_s29 }
   0xe   :  { %p1801_p6 = por %p1800_p5, %p1799_p4 }
  0x10   :  { %p1802_p7 = pnand %p1801_p6, %p1795_p3 }
  0x12   :  { %1805 = shalt.err (!%p1802_p7)
}
  0x13   :  { %33 = dma.hbm_to_vmem [thread:$0]  %s2543_s1, 384, %s31_s19, [#allocation6]  }
  0x14   :  { %s1806_s9 = scalar_lea.hbm %s2542_s0, 3072 }
  0x15   :  { %p1807_p8 = scmp.ne.s32.totalorder %s2542_s0, %s1806_s9  ;;  %p1810_p9 = scmp.lt.u32.totalorder %s1806_s9, %s2542_s0 }
  0x17   :  { %p1812_p10 = pnand %p1810_p9, %p1807_p8 }
  0x19   :  { %1815 = shalt.err (!%p1812_p10)
}
  0x1a   :  { %s1816_s14 = scalar_lea.vmem %s21_s21, 3072  ;;  %p1821_p12 = scmp.lt.s32.totalorder %s21_s21, %s21_s21 }
  0x1b   :  { %p1817_p11 = scmp.ne.s32.totalorder %s21_s21, %s1816_s14  ;;  %p1822_p13 = scmp.lt.s32.totalorder %s1816_s14, %s1816_s14 }
  0x1d   :  { %p1823_p0 = por %p1822_p13, %p1821_p12 }
  0x1f   :  { %p1824_p1 = pnand %p1823_p0, %p1817_p11 }
  0x21   :  { %1827 = shalt.err (!%p1824_p1)
}
  0x22   :  { %23 = dma.hbm_to_vmem [thread:$0]  %s2542_s0, 3072, %s21_s21, [#allocation3]  }
  0x23   :  { %s1904_s16 = smov [#allocation7]   ;;  %s1905_s18 = smov [#allocation8]  }
  0x24   :  { %s40_s17 = sshll.u32 %s1904_s16, 4  ;;  %s49_s19 = sshll.u32 %s1905_s18, 4  ;;  %s41_s17 = int_to_ptr.vmem [resolvable:$true] %s40_s17  ;;  %s1964_s19 = int_to_ptr.vmem [resolvable:$true] %s49_s19 }
  0x25   :  { %s1828_s23 = scalar_lea.hbm %s2544_s2, 384 }
  0x26   :  { %p1829_p2 = scmp.ne.s32.totalorder %s2544_s2, %s1828_s23  ;;  %p1832_p3 = scmp.lt.u32.totalorder %s1828_s23, %s2544_s2 }
  0x28   :  { %p1834_p4 = pnand %p1832_p3, %p1829_p2 }
  0x2a   :  { %1837 = shalt.err (!%p1834_p4)
}
  0x2b   :  { %s1838_s0 = scalar_lea.vmem %s41_s17, 384  ;;  %p1843_p6 = scmp.lt.s32.totalorder %s41_s17, %s41_s17 }
  0x2c   :  { %p1839_p5 = scmp.ne.s32.totalorder %s41_s17, %s1838_s0  ;;  %p1844_p7 = scmp.lt.s32.totalorder %s1838_s0, %s1838_s0 }
  0x2e   :  { %p1845_p8 = por %p1844_p7, %p1843_p6 }
  0x30   :  { %p1846_p9 = pnand %p1845_p8, %p1839_p5 }
  0x32   :  { %1849 = shalt.err (!%p1846_p9)
}
  0x33   :  { %43 = dma.hbm_to_vmem [thread:$0]  %s2544_s2, 384, %s41_s17, [#allocation6]  }
  0x34   :  { %s1850_s6 = scalar_lea.hbm %s2545_s3, 3072 }
  0x35   :  { %p1851_p10 = scmp.ne.s32.totalorder %s2545_s3, %s1850_s6  ;;  %p1854_p11 = scmp.lt.u32.totalorder %s1850_s6, %s2545_s3 }
  0x37   :  { %p1856_p12 = pnand %p1854_p11, %p1851_p10 }
  0x39   :  { %1859 = shalt.err (!%p1856_p12)
}
  0x3a   :  { %s1860_s11 = scalar_lea.vmem %s1964_s19, 3072  ;;  %p1865_p0 = scmp.lt.s32.totalorder %s1964_s19, %s1964_s19 }
  0x3b   :  { %p1861_p13 = scmp.ne.s32.totalorder %s1964_s19, %s1860_s11  ;;  %p1866_p1 = scmp.lt.s32.totalorder %s1860_s11, %s1860_s11 }
  0x3d   :  { %p1867_p2 = por %p1866_p1, %p1865_p0 }
  0x3f   :  { %p1868_p3 = pnand %p1867_p2, %p1861_p13 }
  0x41   :  { %1871 = shalt.err (!%p1868_p3)
}
  0x42   :  { %s1906_s2 = smov 1536   ;;  %s1907_s12 = smov 96  }
  0x43   :  { %55 = dma.hbm_to_vmem [thread:$0]  %s2545_s3, 3072, %s1964_s19, [#allocation9], %s1906_s2, %s1906_s2, %s1907_s12  }
  0x44   :  { %1894 = dma.done.wait [#allocation3], 3072  }
  0x45   :  { %1895 = vsyncadd [#allocation3], 4294964224 }
  0x46   :  { %1896 = dma.done.wait [#allocation6], 768  }
  0x47   :  { %1897 = vsyncadd [#allocation6], 4294966528 }
  0x48   :  { %1898 = dma.done.wait [#allocation9], 3072  }
  0x49   :  { %1899 = vsyncadd [#allocation9], 4294964224  ;;  %v561_v0 = vlaneseq  ;;  %v1908_v1 = vmov 1966171168   ;;  %v1053_v8 = vld [vmem:[#allocation8] sm:$0xff]  ;;  %v1054_v10 = vld [vmem:[#allocation8 + $0x8] sm:$0xff] }
  0x4a   :  { %v559_v2 = vunpack.c.l.s4 %v1908_v1  ;;  %v1065_v9 = vld [vmem:[#allocation8 + $0x60] sm:$0xff]  ;;  %v1066_v16 = vld [vmem:[#allocation8 + $0x68] sm:$0xff]  ;;  %v2007_v17 = vld [vmem:[#allocation2] sm:$0xff]  ;;  %s1909_s15 = smov [#allocation10]   ;;  %vm1684_vm0 = vcmask 130048  }
  0x4b   :  { %v562_v3 = vshrl.u32 %v561_v0, 7  ;;  %v1704_v14 = vcombine.high %v1053_v8, %v1065_v9  ;;  %v1703_v15 = vcombine.low %v1053_v8, %v1065_v9  ;;  %v2009_v18 = vld [vmem:[#allocation2 + $0x8] sm:$0xff]  ;;  %v1706_v21 = vcombine.high %v1054_v10, %v1066_v16  ;;  %v2015_v23 = vld [vmem:[#allocation2 + $0x10] sm:$0xff]  ;;  %v2017_v24 = vld [vmem:[#allocation2 + $0x18] sm:$0xff]  ;;  %s1692_s16 = sshll.u32 %s1909_s15, 4  ;;  %s1693_s16 = int_to_ptr.vmem [resolvable:$true] %s1692_s16 }
  0x4c   :  { %v560_v4 = vunpack.c.0.s8 %v559_v2  ;;  %v1705_v22 = vcombine.low %v1054_v10, %v1066_v16  ;;  %v2019_v25 = vld [vmem:[#allocation2 + $0x20] sm:$0xff]  ;;  %v95_v26 = vrot.slane %v2007_v17, 4  ;;  %v101_v27 = vrot.slane %v2009_v18, 4  ;;  %v2023_v28 = vld [vmem:[#allocation2 + $0x28] sm:$0xff]  ;;  %v2025_v29 = vld [vmem:[#allocation2 + $0x30] sm:$0xff]  ;;  %s1872_s17 = scalar_lea.vmem %s1693_s16, 128  ;;  %p1877_p5 = scmp.lt.s32.totalorder %s1693_s16, %s1693_s16 }
  0x4d   :  { %v1995_v5 = vsub.s32 1, %v562_v3  ;;  %v1997_v6 = vsub.s32 3, %v562_v3  ;;  %v1999_v7 = vsub.s32 0, %v562_v3  ;;  %v2001_v11 = vsub.s32 2, %v562_v3  ;;  %1197 = vmatprep.subr.bf16.mxu0 %v1704_v14  ;;  %v2027_v30 = vld [vmem:[#allocation2 + $0x38] sm:$0xff]  ;;  %1237 = vmatprep.subr.bf16.mxu1 %v1706_v21  ;;  %p1873_p4 = scmp.ne.s32.totalorder %s1693_s16, %s1872_s17  ;;  %p1878_p6 = scmp.lt.s32.totalorder %s1872_s17, %s1872_s17 }
  0x4e   :  { %v2003_v12 = vsub.s32 5, %v562_v3  ;;  %v2005_v13 = vsub.s32 7, %v562_v3  ;;  %v2011_v19 = vsub.s32 4, %v562_v3  ;;  %v2013_v20 = vsub.s32 6, %v562_v3  ;;  %1198 = vmatpush1.bf16.xpose.msra.mxu0 %v1703_v15  ;;  %1238 = vmatpush1.bf16.xpose.msra.mxu1 %v1705_v22 }
  0x4f   :  { %v107_v31 = vrot.slane %v2015_v23, 4  ;;  %v113_v32 = vrot.slane %v2017_v24, 4  ;;  %v119_v33 = vrot.slane %v2019_v25, 4  ;;  %v2032_v34 = vsub.s32 %v560_v4, %v562_v3  ;;  %p1879_p7 = por %p1878_p6, %p1877_p5 }
  0x50   :  { %v96_v35 = vadd.f32 %v95_v26, %v2007_v17  ;;  %v102_v36 = vadd.f32 %v101_v27, %v2009_v18  ;;  %v125_v37 = vrot.slane %v2023_v28, 4  ;;  %v131_v38 = vrot.slane %v2025_v29, 4 }
  0x51   :  { %v108_v39 = vadd.f32 %v107_v31, %v2015_v23  ;;  %v114_v40 = vadd.f32 %v113_v32, %v2017_v24  ;;  %v120_v41 = vadd.f32 %v119_v33, %v2019_v25  ;;  %v137_v42 = vrot.slane %v2027_v30, 4  ;;  %p1880_p8 = pnand %p1879_p7, %p1873_p4 }
  0x52   :  { %v97_v43 = vrot.slane %v96_v35, 2  ;;  %v103_v44 = vrot.slane %v102_v36, 2  ;;  %v126_v45 = vadd.f32 %v125_v37, %v2023_v28  ;;  %v132_v46 = vadd.f32 %v131_v38, %v2025_v29 }
  0x53   :  { %v109_v47 = vrot.slane %v108_v39, 2  ;;  %v115_v48 = vrot.slane %v114_v40, 2  ;;  %v121_v49 = vrot.slane %v120_v41, 2  ;;  %v138_v50 = vadd.f32 %v137_v42, %v2027_v30 }
  0x54   :  { %v98_v51 = vadd.f32 %v97_v43, %v96_v35  ;;  %v104_v52 = vadd.f32 %v103_v44, %v102_v36  ;;  %v127_v53 = vrot.slane %v126_v45, 2  ;;  %v133_v54 = vrot.slane %v132_v46, 2 }
  0x55   :  { %v110_v55 = vadd.f32 %v109_v47, %v108_v39  ;;  %v116_v56 = vadd.f32 %v115_v48, %v114_v40  ;;  %v122_v57 = vadd.f32 %v121_v49, %v120_v41  ;;  %v139_v58 = vrot.slane %v138_v50, 2 }
  0x56   :  { %v99_v59 = vrot.slane %v98_v51, 1  ;;  %v105_v60 = vrot.slane %v104_v52, 1  ;;  %v128_v61 = vadd.f32 %v127_v53, %v126_v45  ;;  %v134_v62 = vadd.f32 %v133_v54, %v132_v46 }
  0x57   :  { %v111_v63 = vrot.slane %v110_v55, 1  ;;  %v117_v0 = vrot.slane %v116_v56, 1  ;;  %v123_v1 = vrot.slane %v122_v57, 1  ;;  %v140_v2 = vadd.f32 %v139_v58, %v138_v50 }
  0x58   :  { %v100_v3 = vadd.f32 %v99_v59, %v98_v51  ;;  %v106_v4 = vadd.f32 %v105_v60, %v104_v52  ;;  %v129_v8 = vrot.slane %v128_v61, 1  ;;  %v135_v9 = vrot.slane %v134_v62, 1 }
  0x59   :  { %v112_v10 = vadd.f32 %v111_v63, %v110_v55  ;;  %v118_v14 = vadd.f32 %v117_v0, %v116_v56  ;;  %v124_v15 = vadd.f32 %v123_v1, %v122_v57  ;;  %v141_v16 = vrot.slane %v140_v2, 1 }
  0x5a   :  { %v130_v21 = vadd.f32 %v129_v8, %v128_v61  ;;  %v136_v22 = vadd.f32 %v135_v9, %v134_v62  ;;  %v239_v26 = vmul.f32 0.125, %v100_v3  ;;  %v240_v27 = vmul.f32 0.125, %v106_v4 }
  0x5b   :  { %v142_v31 = vadd.f32 %v141_v16, %v140_v2  ;;  %v241_v32 = vmul.f32 0.125, %v112_v10  ;;  %v242_v33 = vmul.f32 0.125, %v118_v14  ;;  %v243_v35 = vmul.f32 0.125, %v124_v15 }
  0x5c   :  { %v244_v36 = vmul.f32 0.125, %v130_v21  ;;  %v245_v37 = vmul.f32 0.125, %v136_v22  ;;  %v2046_v38 = vsub.f32 %v2007_v17, %v239_v26  ;;  %v2049_v39 = vsub.f32 %v2009_v18, %v240_v27 }
  0x5d   :  { %v246_v40 = vmul.f32 0.125, %v142_v31  ;;  %v2052_v41 = vsub.f32 %v2015_v23, %v241_v32  ;;  %v2055_v42 = vsub.f32 %v2017_v24, %v242_v33  ;;  %v2058_v43 = vsub.f32 %v2019_v25, %v243_v35 }
  0x5e   :  { %v2061_v44 = vsub.f32 %v2023_v28, %v244_v36  ;;  %v2064_v45 = vsub.f32 %v2025_v29, %v245_v37  ;;  %v287_v17 = vmul.f32 %v2046_v38, %v2046_v38  ;;  %v288_v18 = vmul.f32 %v2049_v39, %v2049_v39 }
  0x5f   :  { %v2071_v23 = vsub.f32 %v2027_v30, %v246_v40  ;;  %v289_v24 = vmul.f32 %v2052_v41, %v2052_v41  ;;  %v290_v25 = vmul.f32 %v2055_v42, %v2055_v42  ;;  %v291_v28 = vmul.f32 %v2058_v43, %v2058_v43 }
  0x60   :  { %v292_v29 = vmul.f32 %v2061_v44, %v2061_v44  ;;  %v293_v46 = vmul.f32 %v2064_v45, %v2064_v45  ;;  %v311_v47 = vrot.slane %v287_v17, 4  ;;  %v317_v48 = vrot.slane %v288_v18, 4 }
  0x61   :  { %v294_v30 = vmul.f32 %v2071_v23, %v2071_v23  ;;  %v323_v49 = vrot.slane %v289_v24, 4  ;;  %v329_v50 = vrot.slane %v290_v25, 4  ;;  %v335_v51 = vrot.slane %v291_v28, 4 }
  0x62   :  { %v312_v52 = vadd.f32 %v311_v47, %v287_v17  ;;  %v318_v53 = vadd.f32 %v317_v48, %v288_v18  ;;  %v341_v54 = vrot.slane %v292_v29, 4  ;;  %v347_v55 = vrot.slane %v293_v46, 4 }
  0x63   :  { %v324_v56 = vadd.f32 %v323_v49, %v289_v24  ;;  %v330_v57 = vadd.f32 %v329_v50, %v290_v25  ;;  %v336_v58 = vadd.f32 %v335_v51, %v291_v28  ;;  %v353_v59 = vrot.slane %v294_v30, 4  ;;  %v2085_v49 = vld [vmem:[#allocation7] sm:$0xff] }
  0x64   :  { %v313_v60 = vrot.slane %v312_v52, 2  ;;  %v319_v61 = vrot.slane %v318_v53, 2  ;;  %v342_v62 = vadd.f32 %v341_v54, %v292_v29  ;;  %v348_v63 = vadd.f32 %v347_v55, %v293_v46  ;;  %v2087_v54 = vld [vmem:[#allocation8 + $0x10] sm:$0xff] }
  0x65   :  { %v325_v0 = vrot.slane %v324_v56, 2  ;;  %v331_v1 = vrot.slane %v330_v57, 2  ;;  %v337_v2 = vrot.slane %v336_v58, 2  ;;  %v354_v3 = vadd.f32 %v353_v59, %v294_v30  ;;  %v2089_v55 = vld [vmem:[#allocation8 + $0x70] sm:$0xff] }
  0x66   :  { %v314_v4 = vadd.f32 %v313_v60, %v312_v52  ;;  %v320_v8 = vadd.f32 %v319_v61, %v318_v53  ;;  %v343_v9 = vrot.slane %v342_v62, 2  ;;  %v349_v10 = vrot.slane %v348_v63, 2  ;;  %2569 = vst [vmem:[#allocation15_spill] sm:$0xff] %v2089_v55  ;;  %v2091_v60 = vld [vmem:[#allocation8 + $0x18] sm:$0xff] }
  0x67   :  { %v326_v14 = vadd.f32 %v325_v0, %v324_v56  ;;  %v332_v15 = vadd.f32 %v331_v1, %v330_v57  ;;  %v338_v16 = vadd.f32 %v337_v2, %v336_v58  ;;  %v355_v21 = vrot.slane %v354_v3, 2  ;;  %2570 = vst [vmem:[#allocation16_spill] sm:$0xff] %v2091_v60  ;;  %v2095_v1 = vld [vmem:[#allocation8 + $0x78] sm:$0xff] }
  0x68   :  { %v315_v22 = vrot.slane %v314_v4, 1  ;;  %v321_v26 = vrot.slane %v320_v8, 1  ;;  %v344_v27 = vadd.f32 %v343_v9, %v342_v62  ;;  %v350_v31 = vadd.f32 %v349_v10, %v348_v63  ;;  %2571 = vst [vmem:[#allocation17_spill] sm:$0xff] %v2095_v1 }
  0x69   :  { %v327_v32 = vrot.slane %v326_v14, 1  ;;  %v333_v33 = vrot.slane %v332_v15, 1  ;;  %v339_v35 = vrot.slane %v338_v16, 1  ;;  %v356_v36 = vadd.f32 %v355_v21, %v354_v3 }
  0x6a   :  { %v316_v37 = vadd.f32 %v315_v22, %v314_v4  ;;  %v322_v40 = vadd.f32 %v321_v26, %v320_v8  ;;  %v345_v17 = vrot.slane %v344_v27, 1  ;;  %v351_v18 = vrot.slane %v350_v31, 1  ;;  %v2111_v26 = vld [vmem:[#allocation8 + $0x28] sm:$0xff] }
  0x6b   :  { %v328_v24 = vadd.f32 %v327_v32, %v326_v14  ;;  %v334_v25 = vadd.f32 %v333_v33, %v332_v15  ;;  %v340_v28 = vadd.f32 %v339_v35, %v338_v16  ;;  %v357_v29 = vrot.slane %v356_v36, 1  ;;  %v2101_v14 = vld [vmem:[#allocation8 + $0x20] sm:$0xff]  ;;  %2574 = vst [vmem:[#allocation20_spill] sm:$0xff] %v2111_v26  ;;  %v2121_v35 = vld [vmem:[#allocation2 + $0x40] sm:$0xff] }
  0x6c   :  { %v346_v46 = vadd.f32 %v345_v17, %v344_v27  ;;  %v352_v47 = vadd.f32 %v351_v18, %v350_v31  ;;  %v455_v48 = vmul.f32 0.125, %v316_v37  ;;  %v456_v30 = vmul.f32 0.125, %v322_v40  ;;  %2572 = vst [vmem:[#allocation18_spill] sm:$0xff] %v2101_v14  ;;  %v2103_v15 = vld [vmem:[#allocation8 + $0x80] sm:$0xff]  ;;  %v2113_v27 = vld [vmem:[#allocation8 + $0x88] sm:$0xff] }
  0x6d   :  { %v358_v50 = vadd.f32 %v357_v29, %v356_v36  ;;  %v457_v51 = vmul.f32 0.125, %v328_v24  ;;  %v458_v52 = vmul.f32 0.125, %v334_v25  ;;  %v459_v53 = vmul.f32 0.125, %v340_v28  ;;  %2573 = vst [vmem:[#allocation19_spill] sm:$0xff] %v2103_v15  ;;  %2575 = vst [vmem:[#allocation21_spill] sm:$0xff] %v2113_v27  ;;  %v2123_v36 = vld [vmem:[#allocation2 + $0x48] sm:$0xff] }
  0x6e   :  { %v460_v56 = vmul.f32 0.125, %v346_v46  ;;  %v461_v57 = vmul.f32 0.125, %v352_v47  ;;  %v482_v58 = vadd.f32 1e-05, %v455_v48  ;;  %v483_v59 = vadd.f32 1e-05, %v456_v30 }
  0x6f   :  { %v462_v61 = vmul.f32 0.125, %v358_v50  ;;  %v484_v62 = vadd.f32 1e-05, %v457_v51  ;;  %v485_v63 = vadd.f32 1e-05, %v458_v52  ;;  %v1708_v16 = vcombine.high %v2087_v54, %v2089_v55  ;;  %v2131_v18 = vld [vmem:[#allocation2 + $0x50] sm:$0xff] }
  0x70   :  { %v486_v2 = vadd.f32 1e-05, %v459_v53  ;;  %v487_v3 = vadd.f32 1e-05, %v460_v56  ;;  %v488_v4 = vadd.f32 1e-05, %v461_v57  ;;  %1736 = vrsqrt.f32 %v482_v58 }
  0x71   :  { %v489_v8 = vadd.f32 1e-05, %v462_v61  ;;  %1738 = vrsqrt.f32 %v483_v59  ;;  %v1710_v32 = vcombine.high %v2091_v60, %v2095_v1  ;;  %1277 = vmatprep.subr.bf16.mxu0 %v1708_v16  ;;  %v2133_v24 = vld [vmem:[#allocation2 + $0x58] sm:$0xff]  ;;  %v2135_v25 = vld [vmem:[#allocation2 + $0x60] sm:$0xff]  ;;  %v2143_v47 = vld [vmem:[#allocation2 + $0x68] sm:$0xff]  ;;  %v143_v51 = vrot.slane %v2121_v35, 4 }
  0x72   :  { %1740 = vrsqrt.f32 %v484_v62  ;;  %v2145_v48 = vld [vmem:[#allocation2 + $0x70] sm:$0xff]  ;;  %v2149_v50 = vld [vmem:[#allocation2 + $0x78] sm:$0xff]  ;;  %v149_v52 = vrot.slane %v2123_v36, 4  ;;  %v155_v53 = vrot.slane %v2131_v18, 4  ;;  %v161_v56 = vrot.slane %v2133_v24, 4 }
  0x73   :  { %1742 = vrsqrt.f32 %v485_v63  ;;  %1317 = vmatprep.subr.bf16.mxu1 %v1710_v32  ;;  %v167_v57 = vrot.slane %v2135_v25, 4  ;;  %v144_v58 = vadd.f32 %v143_v51, %v2121_v35  ;;  %v173_v61 = vrot.slane %v2143_v47, 4 }
  0x74   :  { %1744 = vrsqrt.f32 %v486_v2  ;;  %v150_v59 = vadd.f32 %v149_v52, %v2123_v36  ;;  %v179_v62 = vrot.slane %v2145_v48, 4  ;;  %v156_v63 = vadd.f32 %v155_v53, %v2131_v18 }
  0x75   :  { %1746 = vrsqrt.f32 %v487_v3  ;;  %v162_v2 = vadd.f32 %v161_v56, %v2133_v24  ;;  %v168_v3 = vadd.f32 %v167_v57, %v2135_v25  ;;  %v145_v16 = vrot.slane %v144_v58, 2 }
  0x76   :  { %1748 = vrsqrt.f32 %v488_v4  ;;  %v185_v4 = vrot.slane %v2149_v50, 4  ;;  %v151_v32 = vrot.slane %v150_v59, 2  ;;  %v174_v46 = vadd.f32 %v173_v61, %v2143_v47 }
  0x77   :  { %1750 = vrsqrt.f32 %v489_v8  ;;  %v180_v51 = vadd.f32 %v179_v62, %v2145_v48  ;;  %v157_v40 = vrot.slane %v156_v63, 2  ;;  %v163_v30 = vrot.slane %v162_v2, 2 }
  0x78   :  { %v169_v17 = vrot.slane %v168_v3, 2  ;;  %v186_v31 = vadd.f32 %v185_v4, %v2149_v50  ;;  %v146_v56 = vadd.f32 %v145_v16, %v144_v58  ;;  %v152_v29 = vadd.f32 %v151_v32, %v150_v59 }
  0x79   :  { %v175_v57 = vrot.slane %v174_v46, 2  ;;  %v158_v37 = vadd.f32 %v157_v40, %v156_v63  ;;  %v164_v33 = vadd.f32 %v163_v30, %v162_v2  ;;  %v181_v21 = vrot.slane %v180_v51, 2 }
  0x7a   :  { %v1737_v8 = vpop.eup %1736  ;;  %v170_v22 = vadd.f32 %v169_v17, %v168_v3  ;;  %v147_v0 = vrot.slane %v146_v56, 1  ;;  %v153_v27 = vrot.slane %v152_v29, 1  ;;  %v187_v60 = vrot.slane %v186_v31, 2 }
  0x7b   :  { %v1739_v52 = vpop.eup %1738  ;;  %v159_v15 = vrot.slane %v158_v37, 1  ;;  %v165_v14 = vrot.slane %v164_v33, 1  ;;  %v176_v1 = vadd.f32 %v175_v57, %v174_v46 }
  0x7c   :  { %v1741_v53 = vpop.eup %1740  ;;  %v554_v10 = vcombine.low %v1737_v8, %v1739_v52  ;;  %v171_v4 = vrot.slane %v170_v22, 1  ;;  %v148_v16 = vadd.f32 %v147_v0, %v146_v56  ;;  %v154_v40 = vadd.f32 %v153_v27, %v152_v29 }
  0x7d   :  { %v1743_v28 = vpop.eup %1742  ;;  %v160_v17 = vadd.f32 %v159_v15, %v158_v37  ;;  %v166_v63 = vadd.f32 %v165_v14, %v164_v33  ;;  %v182_v52 = vadd.f32 %v181_v21, %v180_v51  ;;  %v188_v29 = vadd.f32 %v187_v60, %v186_v31 }
  0x7e   :  { %v1745_v9 = vpop.eup %1744  ;;  %v555_v61 = vcombine.low %v1741_v53, %v1743_v28  ;;  %v564_v62 = vrot.slane %v554_v10, %v2032_v34  ;;  %v172_v2 = vadd.f32 %v171_v4, %v170_v22  ;;  %v177_v28 = vrot.slane %v176_v1, 1 }
  0x7f   :  { %v1747_v26 = vpop.eup %1746  ;;  %v247_v55 = vmul.f32 0.125, %v148_v16  ;;  %v248_v46 = vmul.f32 0.125, %v154_v40  ;;  %v183_v0 = vrot.slane %v182_v52, 1  ;;  %v249_v27 = vmul.f32 0.125, %v160_v17 }
  0x80   :  { %v1749_v8 = vpop.eup %1748  ;;  %v556_v58 = vcombine.low %v1745_v9, %v1747_v26  ;;  %v571_v59 = vrot.slane %v555_v61, %v2032_v34  ;;  %v178_v53 = vadd.f32 %v177_v28, %v176_v1  ;;  %v250_v15 = vmul.f32 0.125, %v166_v63 }
  0x81   :  { %v1751_v30 = vpop.eup %1750  ;;  %v251_v14 = vmul.f32 0.125, %v172_v2  ;;  %v184_v37 = vadd.f32 %v183_v0, %v182_v52  ;;  %v2173_v56 = vsub.f32 %v2121_v35, %v247_v55  ;;  %v2176_v1 = vsub.f32 %v2123_v36, %v248_v46  ;;  %v479_v35 = vld [vmem:[#allocation5] sm:$0xff] }
  0x82   :  { %v557_v3 = vcombine.low %v1749_v8, %v1751_v30  ;;  %v578_v10 = vrot.slane %v556_v58, %v2032_v34  ;;  %v586_v32 = vcombine.low %v564_v62, %v571_v59  ;;  %v252_v22 = vmul.f32 0.125, %v178_v53 }
  0x83   :  { %v189_v21 = vrot.slane %v188_v29, 1  ;;  %v2179_v51 = vsub.f32 %v2131_v18, %v249_v27  ;;  %v2182_v57 = vsub.f32 %v2133_v24, %v250_v15  ;;  %v2185_v60 = vsub.f32 %v2135_v25, %v251_v14 }
  0x84   :  { %v585_v9 = vrot.slane %v557_v3, %v2032_v34  ;;  %v594_v26 = vrot.slane %v586_v32, %v2032_v34  ;;  %v253_v61 = vmul.f32 0.125, %v184_v37  ;;  %v2189_v62 = vsub.f32 %v2143_v47, %v252_v22 }
  0x85   :  { %v295_v55 = vmul.f32 %v2173_v56, %v2173_v56  ;;  %v190_v36 = vadd.f32 %v189_v21, %v188_v29  ;;  %v296_v18 = vmul.f32 %v2176_v1, %v2176_v1  ;;  %v297_v24 = vmul.f32 %v2179_v51, %v2179_v51 }
  0x86   :  { %v587_v33 = vcombine.low %v578_v10, %v585_v9  ;;  %v2199_v25 = vmul.f32 %v2182_v57, %v2182_v57  ;;  %v2202_v8 = vsub.f32 %v2145_v48, %v253_v61  ;;  %v2206_v47 = vmul.f32 %v2185_v60, %v2185_v60 }
  0x87   :  { %v2210_v58 = vmul.f32 %v2189_v62, %v2189_v62  ;;  %v254_v59 = vmul.f32 0.125, %v190_v36  ;;  %v359_v16 = vrot.slane %v295_v55, 4  ;;  %v365_v40 = vrot.slane %v296_v18, 4 }
  0x88   :  { %v601_v31 = vrot.slane %v587_v33, %v2032_v34  ;;  %v371_v30 = vrot.slane %v297_v24, 4  ;;  %v2214_v63 = vmul.f32 %v2202_v8, %v2202_v8  ;;  %v377_v48 = vrot.slane %v2199_v25, 4 }
  0x89   :  { %v383_v2 = vrot.slane %v2206_v47, 4  ;;  %v2219_v28 = vsub.f32 %v2149_v50, %v254_v59  ;;  %v360_v3 = vadd.f32 %v359_v16, %v295_v55  ;;  %v366_v10 = vadd.f32 %v365_v40, %v296_v18 }
  0x8a   :  { %v602_v4 = vcombine.low %v594_v26, %v601_v31  ;;  %v372_v32 = vadd.f32 %v371_v30, %v297_v24  ;;  %v2576_v61 = vrot.slane %v2085_v49, %v1995_v5  ;;  %v2582_v18 = vrot.slane %v2085_v49, %v2011_v19 }
  0x8c   :  { %v704_v17 = vmul.f32 %v602_v4, %v479_v35  ;;  %v2581_v35 = vrot.slane %v2085_v49, %v2005_v13  ;;  %v2583_v4 = vrot.slane %v2085_v49, %v2013_v20 }
  0x8e   :  { %v717_v52 = vrot.slane %v704_v17, %v1995_v5  ;;  %v725_v53 = vrot.slane %v704_v17, %v1997_v6  ;;  %v713_v46 = vrot.slane %v704_v17, %v1999_v7  ;;  %v721_v9 = vrot.slane %v704_v17, %v2001_v11 }
  0x8f   :  { %v733_v26 = vrot.slane %v704_v17, %v2003_v12  ;;  %v741_v0 = vrot.slane %v704_v17, %v2005_v13  ;;  %v729_v27 = vrot.slane %v704_v17, %v2011_v19  ;;  %v737_v50 = vrot.slane %v704_v17, %v2013_v20 }
  0x90   :  { %v831_v29 = vmul.f32 %v717_v52, %v2049_v39  ;;  %v833_v15 = vmul.f32 %v725_v53, %v2055_v42  ;;  %v830_v14 = vmul.f32 %v713_v46, %v2046_v38  ;;  %v832_v22 = vmul.f32 %v721_v9, %v2052_v41 }
  0x91   :  { %v835_v33 = vmul.f32 %v733_v26, %v2061_v44  ;;  %v837_v37 = vmul.f32 %v741_v0, %v2071_v23  ;;  %v834_v21 = vmul.f32 %v729_v27, %v2058_v43  ;;  %v836_v31 = vmul.f32 %v737_v50, %v2064_v45 }
  0x92   :  { %v981_v55 = vadd.f32 %v2576_v61, %v831_v29  ;;  %v2577_v39 = vrot.slane %v2085_v49, %v1997_v6  ;;  %v2578_v38 = vrot.slane %v2085_v49, %v1999_v7  ;;  %v2579_v44 = vrot.slane %v2085_v49, %v2001_v11 }
  0x93   :  { %v2580_v43 = vrot.slane %v2085_v49, %v2003_v12  ;;  %v987_v36 = vadd.f32 %v2581_v35, %v837_v37  ;;  %v984_v24 = vadd.f32 %v2582_v18, %v834_v21  ;;  %v986_v59 = vadd.f32 %v2583_v4, %v836_v31  ;;  %v2589_v18 = vld [vmem:[#allocation18_spill] sm:$0xff]  ;;  %v2592_v4 = vld [vmem:[#allocation20_spill] sm:$0xff] }
  0x94   :  { %v983_v42 = vadd.f32 %v2577_v39, %v833_v15  ;;  %v980_v41 = vadd.f32 %v2578_v38, %v830_v14  ;;  %v982_v23 = vadd.f32 %v2579_v44, %v832_v22  ;;  %v1005_v16 = vmax.f32 %v981_v55, 0.0  ;;  %v2587_v44 = vld [vmem:[#allocation17_spill] sm:$0xff] }
  0x95   :  { %v985_v45 = vadd.f32 %v2580_v43, %v835_v33  ;;  %v1011_v53 = vmax.f32 %v987_v36, 0.0  ;;  %v1008_v46 = vmax.f32 %v984_v24, 0.0  ;;  %v1010_v9 = vmax.f32 %v986_v59, 0.0  ;;  %v2590_v24 = vld [vmem:[#allocation19_spill] sm:$0xff]  ;;  %v2593_v59 = vld [vmem:[#allocation21_spill] sm:$0xff] }
  0x96   :  { %v1007_v40 = vmax.f32 %v983_v42, 0.0  ;;  %v1004_v30 = vmax.f32 %v980_v41, 0.0  ;;  %v1006_v17 = vmax.f32 %v982_v23, 0.0  ;;  %v1030_v26 = vpack.c.bf16 %v1005_v16, %v1005_v16  ;;  %v2584_v42 = vld [vmem:[#allocation15_spill] sm:$0xff]  ;;  %v2586_v41 = vld [vmem:[#allocation16_spill] sm:$0xff] }
  0x97   :  { %v1009_v52 = vmax.f32 %v985_v45, 0.0  ;;  %v1036_v15 = vpack.c.bf16 %v1011_v53, %v1011_v53  ;;  %v1033_v14 = vpack.c.bf16 %v1008_v46, %v1008_v46  ;;  %v1035_v22 = vpack.c.bf16 %v1010_v9, %v1010_v9 }
  0x98   :  { %v1032_v0 = vpack.c.bf16 %v1007_v40, %v1007_v40  ;;  %v1029_v27 = vpack.c.bf16 %v1004_v30, %v1004_v30  ;;  %v1031_v50 = vpack.c.bf16 %v1006_v17, %v1006_v17  ;;  %1229 = vmatprep.mubr.bf16.mxu0 %v1030_v26  ;;  %v302_v49 = vmul.f32 %v2219_v28, %v2219_v28 }
  0x99   :  { %v1034_v29 = vpack.c.bf16 %v1009_v52, %v1009_v52  ;;  %v361_v33 = vrot.slane %v360_v3, 2  ;;  %v367_v37 = vrot.slane %v366_v10, 2  ;;  %v373_v21 = vrot.slane %v372_v32, 2 }
  0x9a   :  { %1269 = vmatprep.mubr.bf16.mxu1 %v1032_v0  ;;  %1230 = vmatmul.mubr.bf16.vlgmr.msra.gmra.mrb[0].mxu0 %v1029_v27  ;;  %v378_v31 = vadd.f32 %v377_v48, %v2199_v25  ;;  %v384_v61 = vadd.f32 %v383_v2, %v2206_v47  ;;  %v389_v55 = vrot.slane %v2210_v58, 4  ;;  %v395_v39 = vrot.slane %v2214_v63, 4 }
  0x9b   :  { %1270 = vmatmul.mubr.bf16.vlgmr.msra.gmra.mrb[0].mxu1 %v1031_v50  ;;  %v2585_v38 = vcombine.low %v2087_v54, %v2584_v42  ;;  %v2588_v23 = vcombine.low %v2586_v41, %v2587_v44  ;;  %v362_v43 = vadd.f32 %v361_v33, %v360_v3  ;;  %v368_v45 = vadd.f32 %v367_v37, %v366_v10 }
  0x9c   :  { %v374_v35 = vadd.f32 %v373_v21, %v372_v32  ;;  %v401_v36 = vrot.slane %v302_v49, 4  ;;  %1309 = vmatprep.mubr.bf16.mxu0 %v1034_v29  ;;  %1349 = vmatprep.mubr.bf16.mxu1 %v1036_v15  ;;  %v379_v25 = vrot.slane %v378_v31, 2  ;;  %v385_v47 = vrot.slane %v384_v61, 2  ;;  %v2281_v29 = vld [vmem:[#allocation7 + $0x8] sm:$0xff] }
  0x9d   :  { %1278 = vmatpush1.bf16.xpose.msra.mxu0 %v2585_v38  ;;  %1318 = vmatpush1.bf16.xpose.msra.mxu1 %v2588_v23  ;;  %v390_v48 = vadd.f32 %v389_v55, %v2210_v58  ;;  %v396_v2 = vadd.f32 %v395_v39, %v2214_v63  ;;  %v2591_v54 = vcombine.high %v2589_v18, %v2590_v24  ;;  %v363_v3 = vrot.slane %v362_v43, 1 }
  0x9e   :  { %v2594_v16 = vcombine.high %v2592_v4, %v2593_v59  ;;  %v369_v10 = vrot.slane %v368_v45, 1  ;;  %v375_v32 = vrot.slane %v374_v35, 1  ;;  %v402_v40 = vadd.f32 %v401_v36, %v302_v49  ;;  %v2293_v36 = vld [vmem:[#allocation8 + $0x90] sm:$0xff] }
  0x9f   :  { %1357 = vmatprep.subr.bf16.mxu0 %v2591_v54  ;;  %v380_v30 = vadd.f32 %v379_v25, %v378_v31  ;;  %v386_v17 = vadd.f32 %v385_v47, %v384_v61  ;;  %v391_v52 = vrot.slane %v390_v48, 2  ;;  %v397_v53 = vrot.slane %v396_v2, 2 }
  0xa0   :  { %1397 = vmatprep.subr.bf16.mxu1 %v2594_v16  ;;  %v364_v46 = vadd.f32 %v363_v3, %v362_v43  ;;  %v370_v58 = vadd.f32 %v369_v10, %v368_v45  ;;  %v376_v9 = vadd.f32 %v375_v32, %v374_v35  ;;  %v403_v63 = vrot.slane %v402_v40, 2  ;;  %v2291_v35 = vld [vmem:[#allocation8 + $0x30] sm:$0xff] }
  0xa1   :  { %v381_v26 = vrot.slane %v380_v30, 1  ;;  %v387_v0 = vrot.slane %v386_v17, 1  ;;  %v392_v27 = vadd.f32 %v391_v52, %v390_v48  ;;  %v398_v50 = vadd.f32 %v397_v53, %v396_v2  ;;  %v2297_v2 = vld [vmem:[#allocation8 + $0x38] sm:$0xff]  ;;  %v2309_v52 = vld [vmem:[#allocation8 + $0xa0] sm:$0xff] }
  0xa2   :  { %v404_v15 = vadd.f32 %v403_v63, %v402_v40  ;;  %v463_v33 = vmul.f32 0.125, %v364_v46  ;;  %v464_v37 = vmul.f32 0.125, %v370_v58  ;;  %v465_v21 = vmul.f32 0.125, %v376_v9  ;;  %2597 = vst [vmem:[#allocation15_spill] sm:$0xff] %v2297_v2  ;;  %2600 = vst [vmem:[#allocation18_spill] sm:$0xff] %v2309_v52  ;;  %v2315_v9 = vld [vmem:[#allocation8 + $0x48] sm:$0xff] }
  0xa3   :  { %v382_v49 = vadd.f32 %v381_v26, %v380_v30  ;;  %v388_v31 = vadd.f32 %v387_v0, %v386_v17  ;;  %v393_v61 = vrot.slane %v392_v27, 1  ;;  %v399_v55 = vrot.slane %v398_v50, 1  ;;  %v2307_v17 = vld [vmem:[#allocation8 + $0x40] sm:$0xff]  ;;  %2601 = vst [vmem:[#allocation19_spill] sm:$0xff] %v2315_v9  ;;  %v2317_v63 = vld [vmem:[#allocation8 + $0xa8] sm:$0xff]  ;;  %v2319_v26 = vld [vmem:[#allocation2 + $0x80] sm:$0xff] }
  0xa4   :  { %1310 = vmatmul.mubr.bf16.vlgmr.msra.gmra.mrb[4].mxu0 %v1033_v14  ;;  %1350 = vmatmul.mubr.bf16.vlgmr.msra.gmra.mrb[4].mxu1 %v1035_v22  ;;  %v2595_v39 = vcombine.low %v2589_v18, %v2590_v24  ;;  %v2596_v42 = vcombine.low %v2592_v4, %v2593_v59  ;;  %v405_v38 = vrot.slane %v404_v15, 1  ;;  %v490_v41 = vadd.f32 1e-05, %v463_v33  ;;  %v2299_v18 = vld [vmem:[#allocation8 + $0x98] sm:$0xff]  ;;  %2599 = vst [vmem:[#allocation17_spill] sm:$0xff] %v2307_v17  ;;  %v2329_v33 = vld [vmem:[#allocation2 + $0x90] sm:$0xff] }
  0xa5   :  { %v491_v44 = vadd.f32 1e-05, %v464_v37  ;;  %v394_v14 = vadd.f32 %v393_v61, %v392_v27  ;;  %v400_v22 = vadd.f32 %v399_v55, %v398_v50  ;;  %v466_v43 = vmul.f32 0.125, %v382_v49  ;;  %2598 = vst [vmem:[#allocation16_spill] sm:$0xff] %v2299_v18  ;;  %2602 = vst [vmem:[#allocation20_spill] sm:$0xff] %v2317_v63  ;;  %v2331_v37 = vld [vmem:[#allocation2 + $0x98] sm:$0xff] }
  0xa6   :  { %1358 = vmatpush1.bf16.xpose.msra.mxu0 %v2595_v39  ;;  %1398 = vmatpush1.bf16.xpose.msra.mxu1 %v2596_v42  ;;  %v467_v45 = vmul.f32 0.125, %v388_v31  ;;  %v406_v25 = vadd.f32 %v405_v38, %v404_v15  ;;  %v492_v47 = vadd.f32 1e-05, %v465_v21  ;;  %1752 = vrsqrt.f32 %v490_v41  ;;  %v2327_v15 = vld [vmem:[#allocation2 + $0x88] sm:$0xff]  ;;  %v2339_v61 = vld [vmem:[#allocation2 + $0xa0] sm:$0xff]  ;;  %v2343_v39 = vld [vmem:[#allocation2 + $0xb0] sm:$0xff] }
  0xa7   :  { %v468_v24 = vmul.f32 0.125, %v394_v14  ;;  %v469_v54 = vmul.f32 0.125, %v400_v22  ;;  %v493_v4 = vadd.f32 1e-05, %v466_v43  ;;  %1754 = vrsqrt.f32 %v491_v44  ;;  %v2341_v55 = vld [vmem:[#allocation2 + $0xa8] sm:$0xff]  ;;  %v2351_v44 = vld [vmem:[#allocation2 + $0xb8] sm:$0xff] }
  0xa8   :  { %v494_v59 = vadd.f32 1e-05, %v467_v45  ;;  %v470_v16 = vmul.f32 0.125, %v406_v25  ;;  %v1716_v10 = vcombine.high %v2291_v35, %v2293_v36  ;;  %1756 = vrsqrt.f32 %v492_v47 }
  0xa9   :  { %v495_v32 = vadd.f32 1e-05, %v468_v24  ;;  %v496_v40 = vadd.f32 1e-05, %v469_v54  ;;  %1758 = vrsqrt.f32 %v493_v4  ;;  %v1718_v0 = vcombine.high %v2297_v2, %v2299_v18 }
  0xaa   :  { %v497_v53 = vadd.f32 1e-05, %v470_v16  ;;  %1437 = vmatprep.subr.bf16.mxu0 %v1716_v10  ;;  %1760 = vrsqrt.f32 %v494_v59  ;;  %v191_v14 = vrot.slane %v2319_v26, 4  ;;  %v197_v22 = vrot.slane %v2327_v15, 4 }
  0xab   :  { %1762 = vrsqrt.f32 %v495_v32  ;;  %1477 = vmatprep.subr.bf16.mxu1 %v1718_v0  ;;  %v203_v43 = vrot.slane %v2329_v33, 4  ;;  %v209_v45 = vrot.slane %v2331_v37, 4  ;;  %v215_v25 = vrot.slane %v2339_v61, 4 }
  0xac   :  { %1764 = vrsqrt.f32 %v496_v40  ;;  %v221_v47 = vrot.slane %v2341_v55, 4  ;;  %v227_v24 = vrot.slane %v2343_v39, 4  ;;  %v192_v4 = vadd.f32 %v191_v14, %v2319_v26 }
  0xad   :  { %1766 = vrsqrt.f32 %v497_v53  ;;  %v198_v59 = vadd.f32 %v197_v22, %v2327_v15  ;;  %v204_v16 = vadd.f32 %v203_v43, %v2329_v33  ;;  %v233_v10 = vrot.slane %v2351_v44, 4 }
  0xae   :  { %v210_v32 = vadd.f32 %v209_v45, %v2331_v37  ;;  %v216_v40 = vadd.f32 %v215_v25, %v2339_v61  ;;  %v222_v53 = vadd.f32 %v221_v47, %v2341_v55  ;;  %v228_v0 = vadd.f32 %v227_v24, %v2343_v39 }
  0xaf   :  { %v193_v21 = vrot.slane %v192_v4, 2  ;;  %v199_v41 = vrot.slane %v198_v59, 2  ;;  %v205_v49 = vrot.slane %v204_v16, 2  ;;  %v234_v14 = vadd.f32 %v233_v10, %v2351_v44 }
  0xb0   :  { %v1753_v54 = vpop.eup %1752  ;;  %v211_v3 = vrot.slane %v210_v32, 2  ;;  %v217_v43 = vrot.slane %v216_v40, 2  ;;  %v223_v42 = vrot.slane %v222_v53, 2  ;;  %v229_v25 = vrot.slane %v228_v0, 2 }
  0xb1   :  { %v1755_v38 = vpop.eup %1754  ;;  %v194_v50 = vadd.f32 %v193_v21, %v192_v4  ;;  %v200_v45 = vadd.f32 %v199_v41, %v198_v59  ;;  %v206_v27 = vadd.f32 %v205_v49, %v204_v16 }
  0xb2   :  { %v1757_v58 = vpop.eup %1756  ;;  %v603_v22 = vcombine.low %v1753_v54, %v1755_v38  ;;  %v212_v30 = vadd.f32 %v211_v3, %v210_v32  ;;  %v218_v48 = vadd.f32 %v217_v43, %v216_v40  ;;  %v224_v52 = vadd.f32 %v223_v42, %v222_v53 }
  0xb3   :  { %v1759_v31 = vpop.eup %1758  ;;  %v195_v63 = vrot.slane %v194_v50, 1  ;;  %v201_v9 = vrot.slane %v200_v45, 1  ;;  %v207_v10 = vrot.slane %v206_v27, 1  ;;  %v230_v43 = vadd.f32 %v229_v25, %v228_v0 }
  0xb4   :  { %v1761_v46 = vpop.eup %1760  ;;  %v604_v47 = vcombine.low %v1757_v58, %v1759_v31  ;;  %v613_v24 = vrot.slane %v603_v22, %v2032_v34  ;;  %v213_v18 = vrot.slane %v212_v30, 1  ;;  %v219_v21 = vrot.slane %v218_v48, 1 }
  0xb5   :  { %v1763_v23 = vpop.eup %1762  ;;  %v196_v49 = vadd.f32 %v195_v63, %v194_v50  ;;  %v202_v4 = vadd.f32 %v201_v9, %v200_v45  ;;  %v208_v59 = vadd.f32 %v207_v10, %v206_v27  ;;  %v225_v58 = vrot.slane %v224_v52, 1 }
  0xb6   :  { %v1765_v38 = vpop.eup %1764  ;;  %v605_v54 = vcombine.low %v1761_v46, %v1763_v23  ;;  %v620_v17 = vrot.slane %v604_v47, %v2032_v34  ;;  %v214_v32 = vadd.f32 %v213_v18, %v212_v30  ;;  %v220_v40 = vadd.f32 %v219_v21, %v218_v48 }
  0xb7   :  { %v1767_v41 = vpop.eup %1766  ;;  %v226_v22 = vadd.f32 %v225_v58, %v224_v52  ;;  %v235_v42 = vrot.slane %v234_v14, 2  ;;  %v255_v53 = vmul.f32 0.125, %v196_v49  ;;  %v256_v47 = vmul.f32 0.125, %v202_v4 }
  0xb8   :  { %v606_v31 = vcombine.low %v1765_v38, %v1767_v41  ;;  %v627_v3 = vrot.slane %v605_v54, %v2032_v34  ;;  %v635_v16 = vcombine.low %v613_v24, %v620_v17  ;;  %v231_v2 = vrot.slane %v230_v43, 1 }
  0xb9   :  { %v236_v63 = vadd.f32 %v235_v42, %v234_v14  ;;  %v257_v9 = vmul.f32 0.125, %v208_v59  ;;  %v258_v27 = vmul.f32 0.125, %v214_v32  ;;  %v259_v45 = vmul.f32 0.125, %v220_v40 }
  0xba   :  { %v634_v23 = vrot.slane %v606_v31, %v2032_v34  ;;  %v643_v46 = vrot.slane %v635_v16, %v2032_v34  ;;  %v260_v10 = vmul.f32 0.125, %v226_v22  ;;  %v2375_v17 = vsub.f32 %v2319_v26, %v255_v53  ;;  %v480_v26 = vld [vmem:[#allocation5 + $0x8] sm:$0xff] }
  0xbb   :  { %v232_v48 = vadd.f32 %v231_v2, %v230_v43  ;;  %v237_v18 = vrot.slane %v236_v63, 1  ;;  %v2378_v30 = vsub.f32 %v2327_v15, %v256_v47  ;;  %v2381_v52 = vsub.f32 %v2329_v33, %v257_v9 }
  0xbc   :  { %v636_v50 = vcombine.low %v627_v3, %v634_v23  ;;  %v2385_v14 = vsub.f32 %v2331_v37, %v258_v27  ;;  %v2388_v25 = vsub.f32 %v2339_v61, %v259_v45  ;;  %v2391_v24 = vsub.f32 %v2341_v55, %v260_v10 }
  0xbd   :  { %v238_v2 = vadd.f32 %v237_v18, %v236_v63  ;;  %v261_v38 = vmul.f32 0.125, %v232_v48  ;;  %v303_v15 = vmul.f32 %v2375_v17, %v2375_v17  ;;  %v304_v33 = vmul.f32 %v2378_v30, %v2378_v30 }
  0xbe   :  { %v650_v0 = vrot.slane %v636_v50, %v2032_v34  ;;  %v305_v37 = vmul.f32 %v2381_v52, %v2381_v52  ;;  %v306_v61 = vmul.f32 %v2385_v14, %v2385_v14  ;;  %v307_v55 = vmul.f32 %v2388_v25, %v2388_v25 }
  0xbf   :  { %v262_v21 = vmul.f32 0.125, %v238_v2  ;;  %v2404_v41 = vsub.f32 %v2343_v39, %v261_v38  ;;  %v2408_v49 = vmul.f32 %v2391_v24, %v2391_v24  ;;  %v407_v4 = vrot.slane %v303_v15, 4 }
  0xc0   :  { %v651_v54 = vcombine.low %v643_v46, %v650_v0  ;;  %v413_v58 = vrot.slane %v304_v33, 4  ;;  %v419_v31 = vrot.slane %v305_v37, 4  ;;  %v425_v3 = vrot.slane %v306_v61, 4 }
  0xc1   :  { %v2411_v16 = vsub.f32 %v2351_v44, %v262_v21  ;;  %v2415_v32 = vmul.f32 %v2404_v41, %v2404_v41  ;;  %v408_v40 = vadd.f32 %v407_v4, %v303_v15  ;;  %v431_v22 = vrot.slane %v307_v55, 4 }
  0xc2   :  { %v705_v59 = vmul.f32 %v651_v54, %v480_v26  ;;  %v2603_v0 = vrot.slane %v2281_v29, %v1995_v5  ;;  %v2608_v2 = vrot.slane %v2281_v29, %v2005_v13  ;;  %v2609_v15 = vrot.slane %v2281_v29, %v2011_v19 }
  0xc3   :  { %v2610_v21 = vrot.slane %v2281_v29, %v2013_v20 }
  0xc4   :  { %v749_v39 = vrot.slane %v705_v59, %v1995_v5  ;;  %v757_v43 = vrot.slane %v705_v59, %v1997_v6  ;;  %v745_v42 = vrot.slane %v705_v59, %v1999_v7  ;;  %v753_v23 = vrot.slane %v705_v59, %v2001_v11 }
  0xc5   :  { %v765_v46 = vrot.slane %v705_v59, %v2003_v12  ;;  %v773_v53 = vrot.slane %v705_v59, %v2005_v13  ;;  %v761_v44 = vrot.slane %v705_v59, %v2011_v19  ;;  %v769_v47 = vrot.slane %v705_v59, %v2013_v20 }
  0xc6   :  { %v839_v63 = vmul.f32 %v749_v39, %v2176_v1  ;;  %v841_v9 = vmul.f32 %v757_v43, %v2182_v57  ;;  %v838_v27 = vmul.f32 %v745_v42, %v2173_v56  ;;  %v840_v50 = vmul.f32 %v753_v23, %v2179_v51 }
  0xc7   :  { %v843_v45 = vmul.f32 %v765_v46, %v2189_v62  ;;  %v845_v10 = vmul.f32 %v773_v53, %v2219_v28  ;;  %v842_v48 = vmul.f32 %v761_v44, %v2185_v60  ;;  %v844_v18 = vmul.f32 %v769_v47, %v2202_v8 }
  0xc8   :  { %v989_v26 = vadd.f32 %v2603_v0, %v839_v63  ;;  %v2604_v1 = vrot.slane %v2281_v29, %v1997_v6  ;;  %v2605_v56 = vrot.slane %v2281_v29, %v1999_v7  ;;  %v2606_v62 = vrot.slane %v2281_v29, %v2001_v11 }
  0xc9   :  { %v2607_v60 = vrot.slane %v2281_v29, %v2003_v12  ;;  %v995_v38 = vadd.f32 %v2608_v2, %v845_v10  ;;  %v992_v54 = vadd.f32 %v2609_v15, %v842_v48  ;;  %v994_v4 = vadd.f32 %v2610_v21, %v844_v18  ;;  %v2619_v15 = vld [vmem:[#allocation20_spill] sm:$0xff] }
  0xca   :  { %v991_v57 = vadd.f32 %v2604_v1, %v841_v9  ;;  %v988_v51 = vadd.f32 %v2605_v56, %v838_v27  ;;  %v990_v28 = vadd.f32 %v2606_v62, %v840_v50  ;;  %v1013_v59 = vmax.f32 %v989_v26, 0.0 }
  0xcb   :  { %v993_v8 = vadd.f32 %v2607_v60, %v843_v45  ;;  %v1019_v46 = vmax.f32 %v995_v38, 0.0  ;;  %v1016_v53 = vmax.f32 %v992_v54, 0.0  ;;  %v1018_v44 = vmax.f32 %v994_v4, 0.0  ;;  %v2613_v60 = vld [vmem:[#allocation16_spill] sm:$0xff] }
  0xcc   :  { %v1015_v39 = vmax.f32 %v991_v57, 0.0  ;;  %v1012_v43 = vmax.f32 %v988_v51, 0.0  ;;  %v1014_v42 = vmax.f32 %v990_v28, 0.0  ;;  %v1038_v47 = vpack.c.bf16 %v1013_v59, %v1013_v59  ;;  %v2612_v28 = vld [vmem:[#allocation15_spill] sm:$0xff] }
  0xcd   :  { %v1017_v23 = vmax.f32 %v993_v8, 0.0  ;;  %v1044_v45 = vpack.c.bf16 %v1019_v46, %v1019_v46  ;;  %v1041_v10 = vpack.c.bf16 %v1016_v53, %v1016_v53  ;;  %v1043_v48 = vpack.c.bf16 %v1018_v44, %v1018_v44 }
  0xce   :  { %v1040_v63 = vpack.c.bf16 %v1015_v39, %v1015_v39  ;;  %v1037_v9 = vpack.c.bf16 %v1012_v43, %v1012_v43  ;;  %v1039_v27 = vpack.c.bf16 %v1014_v42, %v1014_v42  ;;  %1389 = vmatprep.mubr.bf16.mxu0 %v1038_v47  ;;  %v310_v29 = vmul.f32 %v2411_v16, %v2411_v16 }
  0xcf   :  { %v1042_v50 = vpack.c.bf16 %v1017_v23, %v1017_v23  ;;  %v409_v18 = vrot.slane %v408_v40, 2  ;;  %v414_v0 = vadd.f32 %v413_v58, %v304_v33  ;;  %v420_v26 = vadd.f32 %v419_v31, %v305_v37 }
  0xd0   :  { %1429 = vmatprep.mubr.bf16.mxu1 %v1040_v63  ;;  %1390 = vmatmul.mubr.bf16.vlgmr.msra.gmra.mrb[8].mxu0 %v1037_v9  ;;  %v426_v1 = vadd.f32 %v425_v3, %v306_v61  ;;  %v432_v57 = vadd.f32 %v431_v22, %v307_v55  ;;  %v437_v56 = vrot.slane %v2408_v49, 4  ;;  %v443_v51 = vrot.slane %v2415_v32, 4  ;;  %v2615_v3 = vld [vmem:[#allocation17_spill] sm:$0xff]  ;;  %v2616_v22 = vld [vmem:[#allocation18_spill] sm:$0xff] }
  0xd1   :  { %1430 = vmatmul.mubr.bf16.vlgmr.msra.gmra.mrb[8].mxu1 %v1039_v27  ;;  %v2611_v62 = vcombine.low %v2291_v35, %v2293_v36  ;;  %v2614_v8 = vcombine.low %v2612_v28, %v2613_v60  ;;  %v410_v2 = vadd.f32 %v409_v18, %v408_v40  ;;  %v415_v38 = vrot.slane %v414_v0, 2  ;;  %1469 = vmatprep.mubr.bf16.mxu0 %v1042_v50  ;;  %v2618_v36 = vld [vmem:[#allocation19_spill] sm:$0xff] }
  0xd2   :  { %v421_v33 = vrot.slane %v420_v26, 2  ;;  %v449_v37 = vrot.slane %v310_v29, 4  ;;  %1509 = vmatprep.mubr.bf16.mxu1 %v1044_v45  ;;  %v427_v61 = vrot.slane %v426_v1, 2  ;;  %v433_v55 = vrot.slane %v432_v57, 2 }
  0xd3   :  { %1438 = vmatpush1.bf16.xpose.msra.mxu0 %v2611_v62  ;;  %1478 = vmatpush1.bf16.xpose.msra.mxu1 %v2614_v8  ;;  %v438_v58 = vadd.f32 %v437_v56, %v2408_v49  ;;  %v444_v31 = vadd.f32 %v443_v51, %v2415_v32  ;;  %v2617_v35 = vcombine.high %v2615_v3, %v2616_v22  ;;  %v411_v40 = vrot.slane %v410_v2, 1 }
  0xd4   :  { %v2620_v54 = vcombine.high %v2618_v36, %v2619_v15  ;;  %v416_v21 = vadd.f32 %v415_v38, %v414_v0  ;;  %v422_v4 = vadd.f32 %v421_v33, %v420_v26  ;;  %v450_v59 = vadd.f32 %v449_v37, %v310_v29 }
  0xd5   :  { %1517 = vmatprep.subr.bf16.mxu0 %v2617_v35  ;;  %v428_v39 = vadd.f32 %v427_v61, %v426_v1  ;;  %v434_v43 = vadd.f32 %v433_v55, %v432_v57  ;;  %v439_v42 = vrot.slane %v438_v58, 2  ;;  %v445_v23 = vrot.slane %v444_v31, 2  ;;  %v2481_v61 = vld [vmem:[#allocation8 + $0x50] sm:$0xff] }
  0xd6   :  { %1557 = vmatprep.subr.bf16.mxu1 %v2620_v54  ;;  %v412_v46 = vadd.f32 %v411_v40, %v410_v2  ;;  %v417_v49 = vrot.slane %v416_v21, 1  ;;  %v423_v53 = vrot.slane %v422_v4, 1  ;;  %v451_v32 = vrot.slane %v450_v59, 2  ;;  %v2483_v55 = vld [vmem:[#allocation8 + $0xb0] sm:$0xff] }
  0xd7   :  { %v429_v44 = vrot.slane %v428_v39, 1  ;;  %v435_v47 = vrot.slane %v434_v43, 1  ;;  %v440_v63 = vadd.f32 %v439_v42, %v438_v58  ;;  %v446_v9 = vadd.f32 %v445_v23, %v444_v31 }
  0xd8   :  { %v418_v27 = vadd.f32 %v417_v49, %v416_v21  ;;  %v424_v50 = vadd.f32 %v423_v53, %v422_v4  ;;  %v452_v45 = vadd.f32 %v451_v32, %v450_v59  ;;  %v471_v18 = vmul.f32 0.125, %v412_v46 }
  0xd9   :  { %v430_v0 = vadd.f32 %v429_v44, %v428_v39  ;;  %v436_v29 = vadd.f32 %v435_v47, %v434_v43  ;;  %v441_v26 = vrot.slane %v440_v63, 1  ;;  %v447_v1 = vrot.slane %v446_v9, 1 }
  0xda   :  { %1470 = vmatmul.mubr.bf16.vlgmr.msra.gmra.mrb[12].mxu0 %v1041_v10  ;;  %1510 = vmatmul.mubr.bf16.vlgmr.msra.gmra.mrb[12].mxu1 %v1043_v48  ;;  %v2621_v57 = vcombine.low %v2615_v3, %v2616_v22  ;;  %v2622_v56 = vcombine.low %v2618_v36, %v2619_v15  ;;  %v453_v51 = vrot.slane %v452_v45, 1  ;;  %v472_v62 = vmul.f32 0.125, %v418_v27  ;;  %v2485_v36 = vld [vmem:[#allocation8 + $0x58] sm:$0xff] }
  0xdb   :  { %v473_v28 = vmul.f32 0.125, %v424_v50  ;;  %v498_v60 = vadd.f32 1e-05, %v471_v18  ;;  %v442_v8 = vadd.f32 %v441_v26, %v440_v63  ;;  %v448_v2 = vadd.f32 %v447_v1, %v446_v9  ;;  %v2487_v15 = vld [vmem:[#allocation8 + $0xb8] sm:$0xff] }
  0xdc   :  { %1518 = vmatpush1.bf16.xpose.msra.mxu0 %v2621_v57  ;;  %1558 = vmatpush1.bf16.xpose.msra.mxu1 %v2622_v56  ;;  %v474_v10 = vmul.f32 0.125, %v430_v0  ;;  %v475_v48 = vmul.f32 0.125, %v436_v29  ;;  %v454_v38 = vadd.f32 %v453_v51, %v452_v45  ;;  %v499_v33 = vadd.f32 1e-05, %v472_v62  ;;  %v856_v57 = vld [vmem:[#allocation7 + $0x10] sm:$0xff]  ;;  %v481_v56 = vld [vmem:[#allocation5 + $0x10] sm:$0xff] }
  0xdd   :  { %v500_v37 = vadd.f32 1e-05, %v473_v28  ;;  %1768 = vrsqrt.f32 %v498_v60  ;;  %v476_v58 = vmul.f32 0.125, %v442_v8  ;;  %v477_v31 = vmul.f32 0.125, %v448_v2 }
  0xde   :  { %v501_v3 = vadd.f32 1e-05, %v474_v10  ;;  %v502_v22 = vadd.f32 1e-05, %v475_v48  ;;  %v478_v35 = vmul.f32 0.125, %v454_v38  ;;  %1770 = vrsqrt.f32 %v499_v33 }
  0xdf   :  { %v503_v54 = vadd.f32 1e-05, %v476_v58  ;;  %v504_v40 = vadd.f32 1e-05, %v477_v31  ;;  %1772 = vrsqrt.f32 %v500_v37  ;;  %v1724_v4 = vcombine.high %v2481_v61, %v2483_v55 }
  0xe0   :  { %v505_v21 = vadd.f32 1e-05, %v478_v35  ;;  %1774 = vrsqrt.f32 %v501_v3  ;;  %v1726_v59 = vcombine.high %v2485_v36, %v2487_v15  ;;  %v931_v62 = vrot.slane %v856_v57, %v1995_v5 }
  0xe1   :  { %1776 = vrsqrt.f32 %v502_v22  ;;  %1597 = vmatprep.subr.bf16.mxu0 %v1724_v4  ;;  %v939_v60 = vrot.slane %v856_v57, %v1997_v6  ;;  %v927_v8 = vrot.slane %v856_v57, %v1999_v7  ;;  %v935_v2 = vrot.slane %v856_v57, %v2001_v11 }
  0xe2   :  { %1778 = vrsqrt.f32 %v503_v54  ;;  %1637 = vmatprep.subr.bf16.mxu1 %v1726_v59  ;;  %v947_v10 = vrot.slane %v856_v57, %v2003_v12  ;;  %v955_v48 = vrot.slane %v856_v57, %v2005_v13  ;;  %v943_v38 = vrot.slane %v856_v57, %v2011_v19 }
  0xe3   :  { %1780 = vrsqrt.f32 %v504_v40 }
  0xe4   :  { %1782 = vrsqrt.f32 %v505_v21 }
  0xe7   :  { %v1769_v39 = vpop.eup %1768 }
  0xe8   :  { %v1771_v43 = vpop.eup %1770 }
  0xe9   :  { %v1773_v42 = vpop.eup %1772  ;;  %v652_v23 = vcombine.low %v1769_v39, %v1771_v43 }
  0xea   :  { %v1775_v46 = vpop.eup %1774 }
  0xeb   :  { %v1777_v49 = vpop.eup %1776  ;;  %v653_v53 = vcombine.low %v1773_v42, %v1775_v46  ;;  %v662_v32 = vrot.slane %v652_v23, %v2032_v34 }
  0xec   :  { %v1779_v44 = vpop.eup %1778 }
  0xed   :  { %v1781_v47 = vpop.eup %1780  ;;  %v654_v63 = vcombine.low %v1777_v49, %v1779_v44  ;;  %v669_v9 = vrot.slane %v653_v53, %v2032_v34 }
  0xee   :  { %v1783_v27 = vpop.eup %1782 }
  0xef   :  { %v655_v50 = vcombine.low %v1781_v47, %v1783_v27  ;;  %v676_v45 = vrot.slane %v654_v63, %v2032_v34  ;;  %v684_v18 = vcombine.low %v662_v32, %v669_v9 }
  0xf1   :  { %v683_v0 = vrot.slane %v655_v50, %v2032_v34  ;;  %v692_v26 = vrot.slane %v684_v18, %v2032_v34 }
  0xf3   :  { %v685_v29 = vcombine.low %v676_v45, %v683_v0 }
  0xf5   :  { %v699_v1 = vrot.slane %v685_v29, %v2032_v34  ;;  %v951_v34 = vrot.slane %v856_v57, %v2013_v20 }
  0xf7   :  { %v700_v51 = vcombine.low %v692_v26, %v699_v1 }
  0xf9   :  { %v706_v28 = vmul.f32 %v700_v51, %v481_v56 }
  0xfb   :  { %v781_v33 = vrot.slane %v706_v28, %v1995_v5  ;;  %v789_v37 = vrot.slane %v706_v28, %v1997_v6  ;;  %v777_v58 = vrot.slane %v706_v28, %v1999_v7  ;;  %v785_v31 = vrot.slane %v706_v28, %v2001_v11 }
  0xfc   :  { %v797_v3 = vrot.slane %v706_v28, %v2003_v12  ;;  %v805_v22 = vrot.slane %v706_v28, %v2005_v13  ;;  %v793_v35 = vrot.slane %v706_v28, %v2011_v19  ;;  %v801_v54 = vrot.slane %v706_v28, %v2013_v20 }
  0xfd   :  { %v847_v40 = vmul.f32 %v781_v33, %v2378_v30  ;;  %v849_v21 = vmul.f32 %v789_v37, %v2385_v14  ;;  %v846_v5 = vmul.f32 %v777_v58, %v2375_v17  ;;  %v848_v6 = vmul.f32 %v785_v31, %v2381_v52 }
  0xfe   :  { %v851_v7 = vmul.f32 %v797_v3, %v2391_v24  ;;  %v853_v11 = vmul.f32 %v805_v22, %v2411_v16  ;;  %v850_v12 = vmul.f32 %v793_v35, %v2388_v25  ;;  %v852_v13 = vmul.f32 %v801_v54, %v2404_v41 }
  0xff   :  { %v997_v4 = vadd.f32 %v931_v62, %v847_v40  ;;  %v999_v19 = vadd.f32 %v939_v60, %v849_v21  ;;  %v996_v59 = vadd.f32 %v927_v8, %v846_v5  ;;  %v998_v20 = vadd.f32 %v935_v2, %v848_v6 }
 0x100   :  { %v1723_v30 = vcombine.low %v2481_v61, %v2483_v55  ;;  %v1725_v17 = vcombine.low %v2485_v36, %v2487_v15  ;;  %v1001_v14 = vadd.f32 %v947_v10, %v851_v7  ;;  %v1003_v52 = vadd.f32 %v955_v48, %v853_v11 }
 0x101   :  { %v1021_v39 = vmax.f32 %v997_v4, 0.0  ;;  %v1023_v24 = vmax.f32 %v999_v19, 0.0  ;;  %v1020_v43 = vmax.f32 %v996_v59, 0.0  ;;  %v1022_v16 = vmax.f32 %v998_v20, 0.0 }
 0x102   :  { %v1025_v42 = vmax.f32 %v1001_v14, 0.0  ;;  %v1027_v25 = vmax.f32 %v1003_v52, 0.0  ;;  %v1000_v23 = vadd.f32 %v943_v38, %v850_v12  ;;  %v1002_v41 = vadd.f32 %v951_v34, %v852_v13 }
 0x103   :  { %v1046_v46 = vpack.c.bf16 %v1021_v39, %v1021_v39  ;;  %v1048_v49 = vpack.c.bf16 %v1023_v24, %v1023_v24  ;;  %v1045_v53 = vpack.c.bf16 %v1020_v43, %v1020_v43  ;;  %v1047_v32 = vpack.c.bf16 %v1022_v16, %v1022_v16 }
 0x104   :  { %v1050_v44 = vpack.c.bf16 %v1025_v42, %v1025_v42  ;;  %v1052_v47 = vpack.c.bf16 %v1027_v25, %v1027_v25  ;;  %v1024_v61 = vmax.f32 %v1000_v23, 0.0  ;;  %v1026_v55 = vmax.f32 %v1002_v41, 0.0 }
 0x105   :  { %1549 = vmatprep.mubr.bf16.mxu0 %v1046_v46  ;;  %1589 = vmatprep.mubr.bf16.mxu1 %v1048_v49  ;;  %v1727_v46 = vld [vmem:[%s2546_s4] ss:$0 sm:$0xff] }
 0x106   :  { %1550 = vmatmul.mubr.bf16.vlgmr.msra.gmra.mrb[16].mxu0 %v1045_v53  ;;  %1590 = vmatmul.mubr.bf16.vlgmr.msra.gmra.mrb[16].mxu1 %v1047_v32  ;;  %v1049_v36 = vpack.c.bf16 %v1024_v61, %v1024_v61  ;;  %v1051_v15 = vpack.c.bf16 %v1026_v55, %v1026_v55 }
 0x107   :  { %1598 = vmatpush1.bf16.xpose.msra.mxu0 %v1723_v30  ;;  %1638 = vmatpush1.bf16.xpose.msra.mxu1 %v1725_v17 }
 0x108   :  { %1629 = vmatprep.mubr.bf16.mxu0 %v1050_v44  ;;  %1669 = vmatprep.mubr.bf16.mxu1 %v1052_v47 }
 0x10e   :  { %1630 = vmatmul.mubr.bf16.vlgmr.msra.gmra.mrb[20].mxu0 %v1049_v36  ;;  %1670 = vmatmul.mubr.bf16.vlgmr.msra.gmra.mrb[20].mxu1 %v1051_v15 }
 0x16d   :  { %v1231_v63 = vpop.f32.mrb[0].mxu0 }
 0x16e   :  { %v1271_v9 = vpop.f32.mrb[0].mxu1  ;;  %v1233_v50 = vpop.f32.mrb[1].mxu0 }
 0x16f   :  { %v1272_v27 = vadd.f32 %v1271_v9, %v1231_v63  ;;  %v1273_v45 = vpop.f32.mrb[1].mxu1  ;;  %v1234_v18 = vpop.f32.mrb[2].mxu0 }
 0x170   :  { %v1274_v0 = vpop.f32.mrb[2].mxu1  ;;  %v1235_v29 = vpop.f32.mrb[3].mxu0 }
 0x171   :  { %v1275_v26 = vpop.f32.mrb[3].mxu1 }
 0x177   :  { %v1311_v1 = vpop.f32.mrb[4].mxu0  ;;  %v1351_v57 = vpop.f32.mrb[4].mxu1 }
 0x178   :  { %v1312_v56 = vadd.f32 %v1311_v1, %v1272_v27  ;;  %v1313_v51 = vpop.f32.mrb[5].mxu0  ;;  %v1353_v62 = vpop.f32.mrb[5].mxu1 }
 0x179   :  { %v1314_v28 = vpop.f32.mrb[6].mxu0  ;;  %v1354_v60 = vpop.f32.mrb[6].mxu1 }
 0x17a   :  { %v1352_v8 = vadd.f32 %v1351_v57, %v1312_v56  ;;  %v1315_v2 = vpop.f32.mrb[7].mxu0  ;;  %v1355_v10 = vpop.f32.mrb[7].mxu1 }
 0x1a3   :  { %v1391_v48 = vpop.f32.mrb[8].mxu0 }
 0x1a4   :  { %v1431_v38 = vpop.f32.mrb[8].mxu1  ;;  %v1392_v34 = vadd.f32 %v1391_v48, %v1352_v8  ;;  %v1393_v33 = vpop.f32.mrb[9].mxu0 }
 0x1a5   :  { %v1433_v37 = vpop.f32.mrb[9].mxu1  ;;  %v1394_v58 = vpop.f32.mrb[10].mxu0 }
 0x1a6   :  { %v1434_v31 = vpop.f32.mrb[10].mxu1  ;;  %v1432_v3 = vadd.f32 %v1431_v38, %v1392_v34  ;;  %v1395_v22 = vpop.f32.mrb[11].mxu0 }
 0x1a7   :  { %v1435_v35 = vpop.f32.mrb[11].mxu1 }
 0x1ad   :  { %v1471_v54 = vpop.f32.mrb[12].mxu0  ;;  %v1511_v40 = vpop.f32.mrb[12].mxu1 }
 0x1ae   :  { %v1472_v21 = vadd.f32 %v1471_v54, %v1432_v3  ;;  %v1473_v5 = vpop.f32.mrb[13].mxu0  ;;  %v1513_v6 = vpop.f32.mrb[13].mxu1 }
 0x1af   :  { %v1474_v7 = vpop.f32.mrb[14].mxu0  ;;  %v1514_v11 = vpop.f32.mrb[14].mxu1 }
 0x1b0   :  { %v1512_v12 = vadd.f32 %v1511_v40, %v1472_v21  ;;  %v1475_v13 = vpop.f32.mrb[15].mxu0  ;;  %v1515_v4 = vpop.f32.mrb[15].mxu1 }
 0x1d9   :  { %v1551_v19 = vpop.f32.mrb[16].mxu0  ;;  %v1591_v59 = vpop.f32.mrb[16].mxu1 }
 0x1da   :  { %v1552_v20 = vadd.f32 %v1551_v19, %v1512_v12  ;;  %v1553_v30 = vpop.f32.mrb[17].mxu0  ;;  %v1593_v17 = vpop.f32.mrb[17].mxu1 }
 0x1db   :  { %v1554_v14 = vpop.f32.mrb[18].mxu0  ;;  %v1594_v52 = vpop.f32.mrb[18].mxu1 }
 0x1dc   :  { %v1592_v39 = vadd.f32 %v1591_v59, %v1552_v20  ;;  %v1555_v24 = vpop.f32.mrb[19].mxu0  ;;  %v1595_v43 = vpop.f32.mrb[19].mxu1 }
 0x1e1   :  { %v1631_v16 = vpop.f32.mrb[20].mxu0  ;;  %v1671_v42 = vpop.f32.mrb[20].mxu1 }
 0x1e2   :  { %v1632_v25 = vadd.f32 %v1631_v16, %v1592_v39  ;;  %v1633_v23 = vpop.f32.mrb[21].mxu0  ;;  %v1673_v41 = vpop.f32.mrb[21].mxu1 }
 0x1e3   :  { %v1634_v49 = vpop.f32.mrb[22].mxu0  ;;  %v1674_v53 = vpop.f32.mrb[22].mxu1 }
 0x1e4   :  { %v1672_v32 = vadd.f32 %v1671_v42, %v1632_v25  ;;  %v1635_v44 = vpop.f32.mrb[23].mxu0  ;;  %v1675_v47 = vpop.f32.mrb[23].mxu1 }
 0x1e6   :  { %v1683_v61 = vadd.f32 %v1727_v46, %v1672_v32 }
 0x1e8   :  { %1685 = vst.msk [vmem:[#allocation10] sm:$0xff] %vm1684_vm0, %v1683_v61 }
 0x1e9   :  { %1883 = shalt.err (!%p1880_p8)
}
 0x1ea   :  { %s1884_s19 = scalar_lea.hbm %s2547_s5, 128 }
 0x1eb   :  { %p1885_p9 = scmp.ne.s32.totalorder %s2547_s5, %s1884_s19  ;;  %p1888_p10 = scmp.lt.u32.totalorder %s1884_s19, %s2547_s5 }
 0x1ed   :  { %p1890_p11 = pnand %p1888_p10, %p1885_p9 }
 0x1ef   :  { %1893 = shalt.err (!%p1890_p11)
}
 0x1f0   :  { %1695 = dma.vmem_to_hbm [thread:$0]  %s1693_s16, 128, %s2547_s5, [#allocation4]  }
 0x1f1   :  { %1900 = dma.done.wait [#allocation4], 128  }
 0x1f2   :  { %1901 = vsyncadd [#allocation4], 4294967168 }
 0x1f3   :  { %1699 = vsyncpa [#allocation3], 1 }
 0x1f4   :  { %1700 = vsyncpa [#allocation6], 1 }
 0x1f5   :  { %1701 = vsyncpa [#allocation9], 1 }
 0x1f6   :  { %1702 = vsyncpa [#allocation4], 1 }

</bundles_post_ra>
